<compile_context>
chip_gen: v7x
topology: tpu7x:2x2x1
jax: 0.10.0
libtpu: 0.0.40
codegen_flags: <defaults>
</compile_context>

<pallas_src>
import math

import jax
import jax.numpy as jnp
from jax import lax
from jax.experimental import pallas as pl
from jax.experimental.pallas import tpu as pltpu


# Scoped-VMEM cap: above the 16/32 MiB compiler defaults, below v7x's 64 MiB
# physical VMEM (leaves headroom for internal scratch).
_VMEM_LIMIT = 48 << 20


def _pick_tile(n, candidates):
    for c in candidates:
        if n % c == 0:
            return c
    return n  # ragged fallback: full extent (always a legal block)


def _linear_row_tile(n, d_in, d_out, budget=_VMEM_LIMIT):
    """Largest row tile dividing n whose pipeline buffers fit the VMEM budget."""
    divisors = [tm for tm in (1024, 512, 256, 128, 64, 32, 16, 8) if n % tm == 0]
    for tm in divisors:
        need = (2 * tm * d_in * 4          # x tiles, double-buffered (f32 worst case)
                + 2 * tm * d_out * 4       # out tiles, double-buffered
                + 2 * d_in * d_out * 2     # resident bf16 weight (pipeline double-allocs)
                + 2 * d_out * 4)           # resident bias
        if need <= budget:
            return tm
    # TODO(synk): for very large d_model the resident (d_in, d_out) weight alone
    # exceeds the budget; add a K/N grid axis with an f32 VMEM accumulator.
    return divisors[-1] if divisors else n


# ---------------------------------------------------------------------------
# Row-tiled Linear:  y = x @ W + b
#   W, b VMEM-resident across the row grid (constant index_maps); x/out tiles
#   pipelined.  bf16 MXU operands, f32 accumulation, out dtype configurable.
# ---------------------------------------------------------------------------
def _linear_kernel(x_ref, w_ref, b_ref, o_ref):
    x = x_ref[...].astype(jnp.bfloat16)                        # (TM, Din) bf16 operand
    y = jnp.dot(x, w_ref[...], preferred_element_type=jnp.float32)
    o_ref[...] = (y + b_ref[...]).astype(o_ref.dtype)          # f32 bias add, cast out


def _linear(x2, w_bf16, b_f32, out_dtype):
    n, d_in = x2.shape
    d_out = w_bf16.shape[1]
    tm = _linear_row_tile(n, d_in, d_out)
    return pl.pallas_call(
        _linear_kernel,
        out_shape=jax.ShapeDtypeStruct((n, d_out), out_dtype),
        grid=(n // tm,),
        in_specs=[
            pl.BlockSpec((tm, d_in), lambda i: (i, 0)),        # x tile (pipelined)
            pl.BlockSpec((d_in, d_out), lambda i: (0, 0)),     # W resident (bf16)
            pl.BlockSpec((1, d_out), lambda i: (0, 0)),        # b resident (f32)
        ],
        out_specs=pl.BlockSpec((tm, d_out), lambda i: (i, 0)),
        compiler_params=pltpu.CompilerParams(
            dimension_semantics=("parallel",),
            vmem_limit_bytes=_VMEM_LIMIT),
    )(x2, w_bf16, b_f32.reshape(1, d_out))


# ---------------------------------------------------------------------------
# Flash-style scaled dot-product attention.
#   grid = (batch, head, q_tile, kv_tile); kv innermost / "arbitrary".
#   Head h is selected via the last-axis block index (block width = dh), so
#   loads/stores stay lane-dense (requires dh % 128 == 0 or dh == d_model).
#   Q is pre-scaled by 1/sqrt(dh) (folded into the projection weights).
# ---------------------------------------------------------------------------
def _flash_body(q_ref, k_ref, v_ref, o_ref, m_sc, l_sc, acc_sc, mask=None):
    kv = pl.program_id(3)

    @pl.when(kv == 0)
    def _init():
        m_sc[...] = jnp.full(m_sc.shape, -jnp.inf, dtype=jnp.float32)
        l_sc[...] = jnp.zeros(l_sc.shape, dtype=jnp.float32)
        acc_sc[...] = jnp.zeros(acc_sc.shape, dtype=jnp.float32)

    # scores: (TQ, TK) f32; q/k are bf16 MXU operands.
    s = lax.dot_general(q_ref[...], k_ref[...], (((1,), (1,)), ((), ())),
                        preferred_element_type=jnp.float32)
    if mask is not None:
        s = jnp.where(mask != 0, -1e18, s)                     # masked_fill(mask, -1e18)

    m_prev = m_sc[...]
    m_new = jnp.maximum(m_prev, jnp.max(s, axis=-1, keepdims=True))
    alpha = jnp.exp(m_prev - m_new)
    p = jnp.exp(s - m_new)
    l_sc[...] = alpha * l_sc[...] + jnp.sum(p, axis=-1, keepdims=True)
    acc_sc[...] = alpha * acc_sc[...] + jnp.dot(
        p.astype(jnp.bfloat16), v_ref[...], preferred_element_type=jnp.float32)
    m_sc[...] = m_new

    @pl.when(kv == pl.num_programs(3) - 1)
    def _finalize():
        # Normalize the (TQ, dh) context once (not the (TQ, Lk) probabilities).
        o_ref[...] = (acc_sc[...] *
                      pl.reciprocal(l_sc[...], approx=True)).astype(o_ref.dtype)


def _flash_kernel_nomask(q_ref, k_ref, v_ref, o_ref, m_sc, l_sc, acc_sc):
    _flash_body(q_ref, k_ref, v_ref, o_ref, m_sc, l_sc, acc_sc)


def _flash_kernel_mask(q_ref, k_ref, v_ref, mask_ref, o_ref, m_sc, l_sc, acc_sc):
    _flash_body(q_ref, k_ref, v_ref, o_ref, m_sc, l_sc, acc_sc, mask=mask_ref[...])


def _attention(q, k, v, mask_i8, head_count):
    b, lq, d = q.shape
    lk = k.shape[1]
    dh = d // head_count
    tq = _pick_tile(lq, (512, 256, 128, 64, 32, 16, 8))
    tk = _pick_tile(lk, (512, 256, 128, 64, 32, 16, 8))
    grid = (b, head_count, lq // tq, lk // tk)

    q_spec = pl.BlockSpec((None, tq, dh), lambda bi, h, qi, ki: (bi, qi, h))
    k_spec = pl.BlockSpec((None, tk, dh), lambda bi, h, qi, ki: (bi, ki, h))
    v_spec = pl.BlockSpec((None, tk, dh), lambda bi, h, qi, ki: (bi, ki, h))
    o_spec = pl.BlockSpec((None, tq, dh), lambda bi, h, qi, ki: (bi, qi, h))
    scratch = [pltpu.VMEM((tq, 1), jnp.float32),      # running max
               pltpu.VMEM((tq, 1), jnp.float32),      # running sum
               pltpu.VMEM((tq, dh), jnp.float32)]     # context accumulator
    cparams = pltpu.CompilerParams(
        dimension_semantics=("parallel", "parallel", "parallel", "arbitrary"),
        vmem_limit_bytes=_VMEM_LIMIT)
    out_shape = jax.ShapeDtypeStruct((b, lq, d), jnp.bfloat16)

    if mask_i8 is None:
        return pl.pallas_call(
            _flash_kernel_nomask, out_shape=out_shape, grid=grid,
            in_specs=[q_spec, k_spec, v_spec], out_specs=o_spec,
            scratch_shapes=scratch, compiler_params=cparams,
        )(q, k, v)

    m_spec = pl.BlockSpec((None, tq, tk), lambda bi, h, qi, ki: (bi, qi, ki))
    return pl.pallas_call(
        _flash_kernel_mask, out_shape=out_shape, grid=grid,
        in_specs=[q_spec, k_spec, v_spec, m_spec], out_specs=o_spec,
        scratch_shapes=scratch, compiler_params=cparams,
    )(q, k, v, mask_i8)


# ---------------------------------------------------------------------------
# Full module forward (no layer_cache, no topic, use_final_linear=True).
# ---------------------------------------------------------------------------
def multi_headed_attention(key, value, query, params, head_count, mask=None):
    """key/value: (B, Lk, D); query: (B, Lq, D); mask: optional boolean,
    broadcastable to (B, Lq, Lk), True = masked out.  params hold f32 weights
    in (in, out) layout + f32 biases.  Returns (B, Lq, D) in query.dtype."""
    b, lq, d = query.shape
    lk = key.shape[1]
    assert d % head_count == 0
    dh = d // head_count
    # Head slicing via last-axis block index needs lane-dense head columns.
    assert dh % 128 == 0 or dh == d, "dim_per_head must be a multiple of 128"
    scale = 1.0 / math.sqrt(dh)

    # bf16 weight prep; fold 1/sqrt(dh) into the query projection.
    wq = (params["wq"] * scale).astype(jnp.bfloat16)
    bq = (params["bq"] * scale).astype(jnp.float32)
    wk = params["wk"].astype(jnp.bfloat16)
    bk = params["bk"].astype(jnp.float32)
    wv = params["wv"].astype(jnp.bfloat16)
    bv = params["bv"].astype(jnp.float32)
    wo = params["wo"].astype(jnp.bfloat16)
    bo = params["bo"].astype(jnp.float32)

    if (query is key) and (query is value):
        # Self-attention: fused (d, 3d) projection -> one activation read.
        w_qkv = jnp.concatenate([wq, wk, wv], axis=1)
        b_qkv = jnp.concatenate([bq, bk, bv], axis=0)
        qkv = _linear(query.reshape(b * lq, d), w_qkv, b_qkv, jnp.bfloat16)
        q = qkv[:, :d].reshape(b, lq, d)
        k = qkv[:, d:2 * d].reshape(b, lk, d)
        v = qkv[:, 2 * d:].reshape(b, lk, d)
    else:
        q = _linear(query.reshape(b * lq, d), wq, bq, jnp.bfloat16).reshape(b, lq, d)
        k = _linear(key.reshape(b * lk, d), wk, bk, jnp.bfloat16).reshape(b, lk, d)
        v = _linear(value.reshape(b * lk, d), wv, bv, jnp.bfloat16).reshape(b, lk, d)

    if mask is None:
        mask_i8 = None                                   # no mask stream at all
    else:
        mask_i8 = jnp.broadcast_to(mask, (b, lq, lk)).astype(jnp.int8)

    ctx = _attention(q, k, v, mask_i8, head_count)       # (B, Lq, D) bf16

    out = _linear(ctx.reshape(b * lq, d), wo, bo, out_dtype=query.dtype)
    return out.reshape(b, lq, d)


# ---------------------------------------------------------------------------
# Pure-JAX f32 reference (mirrors the PyTorch forward).
# ---------------------------------------------------------------------------
def _reference(key, value, query, p32, head_count, mask):
    b, lq, d = query.shape
    lk = key.shape[1]
    dh = d // head_count
    q = query @ p32["wq"] + p32["bq"]
    k = key @ p32["wk"] + p32["bk"]
    v = value @ p32["wv"] + p32["bv"]

    def shape(x, l):
        return x.reshape(b, l, head_count, dh).transpose(0, 2, 1, 3)

    qh = shape(q, lq) / math.sqrt(dh)
    kh = shape(k, lk)
    vh = shape(v, lk)
    scores = jnp.einsum("bhqd,bhkd->bhqk", qh, kh)
    if mask is not None:
        scores = jnp.where(mask[:, None, :, :], -1e18, scores)
    attn = jax.nn.softmax(scores, axis=-1)
    ctx = jnp.einsum("bhqk,bhkd->bhqd", attn, vh)
    ctx = ctx.transpose(0, 2, 1, 3).reshape(b, lq, d)
    return ctx @ p32["wo"] + p32["bo"]


if __name__ == "__main__":
    # Small TPU-tile-friendly shapes: dim_per_head = 128 (lane-dense),
    # batch*seq a multiple of 8.
    batch, seq, head_count, d_model = 2, 8, 2, 256

    root = jax.random.PRNGKey(0)
    keys = jax.random.split(root, 11)

    key_in = jax.random.normal(keys[0], (batch, seq, d_model), dtype=jnp.float32)
    value_in = jax.random.normal(keys[1], (batch, seq, d_model), dtype=jnp.float32)
    query_in = jax.random.normal(keys[2], (batch, seq, d_model), dtype=jnp.float32)

    def init_linear(kw, kb):
        w = jax.random.normal(kw, (d_model, d_model), jnp.float32) / math.sqrt(d_model)
        bias = jax.random.normal(kb, (d_model,), jnp.float32) * 0.02
        return w, bias

    wq, bq = init_linear(keys[3], keys[4])
    wk, bk = init_linear(keys[5], keys[6])
    wv, bv = init_linear(keys[7], keys[8])
    wo, bo = init_linear(keys[9], keys[10])

    params = dict(wq=wq, bq=bq, wk=wk, bk=bk, wv=wv, bv=bv, wo=wo, bo=bo)

    # Padding mask: batch 1 may not attend to the last two key positions.
    mask = jnp.zeros((batch, seq, seq), dtype=bool)
    mask = mask.at[1, :, seq - 2:].set(True)

    tol = dict(atol=6e-2, rtol=6e-2)   # bf16 operands/intermediates vs f32 ref

    # 1) masked cross-attention
    out = multi_headed_attention(key_in, value_in, query_in, params,
                                 head_count, mask=mask)
    out = jax.block_until_ready(out)
    ref = _reference(key_in, value_in, query_in, params, head_count, mask)
    assert out.shape == query_in.shape and out.dtype == query_in.dtype
    err = float(jnp.max(jnp.abs(out - ref)))
    assert jnp.allclose(out, ref, **tol), "masked mismatch, max abs err = %f" % err

    # 2) no-mask cross-attention (exercises the no-mask kernel variant)
    out_nm = multi_headed_attention(key_in, value_in, query_in, params, head_count)
    out_nm = jax.block_until_ready(out_nm)
    ref_nm = _reference(key_in, value_in, query_in, params, head_count, None)
    err = float(jnp.max(jnp.abs(out_nm - ref_nm)))
    assert jnp.allclose(out_nm, ref_nm, **tol), "no-mask mismatch, max abs err = %f" % err

    # 3) self-attention (exercises the fused QKV projection path)
    out_sa = multi_headed_attention(query_in, query_in, query_in, params, head_count)
    out_sa = jax.block_until_ready(out_sa)
    ref_sa = _reference(query_in, query_in, query_in, params, head_count, None)
    err = float(jnp.max(jnp.abs(out_sa - ref_sa)))
    assert jnp.allclose(out_sa, ref_sa, **tol), "self-attn mismatch, max abs err = %f" % err

    print("KERNEL_OK")
</pallas_src>

<mosaic_0001>
module attributes {stable_mosaic.version = 11 : i64} {
  func.func @_linear_kernel(%arg0: i32, %arg1: memref<16x256xf32, #tpu.memory_space<vmem>>, %arg2: memref<256x256xbf16, #tpu.memory_space<vmem>>, %arg3: memref<1x256xf32, #tpu.memory_space<vmem>>, %arg4: memref<16x256xbf16, #tpu.memory_space<vmem>>) attributes {dimension_semantics = [#tpu.dimension_semantics<parallel>], iteration_bounds = array<i64: 1>, scalar_prefetch = 0 : i64, scratch_operands = 0 : i64, tpu.core_type = #tpu.core_type<tc>, window_params = [{transform_indices = @transform_0, window_bounds = array<i64: 16, 256>}, {pipeline_mode = #tpu.pipeline_mode<synchronous>, transform_indices = @transform_1, window_bounds = array<i64: 256, 256>}, {pipeline_mode = #tpu.pipeline_mode<synchronous>, transform_indices = @transform_2, window_bounds = array<i64: 1, 256>}, {transform_indices = @transform_3, window_bounds = array<i64: 16, 256>}]} {
    %c0 = arith.constant 0 : index
    %c0_0 = arith.constant 0 : index
    %0 = vector.load %arg1[%c0, %c0_0] : memref<16x256xf32, #tpu.memory_space<vmem>>, vector<16x256xf32>
    %1 = arith.truncf %0 : vector<16x256xf32> to vector<16x256xbf16>
    %c0_1 = arith.constant 0 : index
    %c0_2 = arith.constant 0 : index
    %2 = vector.load %arg2[%c0_1, %c0_2] : memref<256x256xbf16, #tpu.memory_space<vmem>>, vector<256x256xbf16>
    %cst = arith.constant dense<0.000000e+00> : vector<16x256xf32>
    %3 = tpu.matmul %1, %2, %cst {dimension_numbers = #tpu.dot_dimension_numbers<[1], [0], [0], [1], [0, 0, 1, 1], [], []>} : vector<16x256xbf16>, vector<256x256xbf16>, vector<16x256xf32> -> vector<16x256xf32>
    %c0_3 = arith.constant 0 : index
    %c0_4 = arith.constant 0 : index
    %4 = vector.load %arg3[%c0_3, %c0_4] : memref<1x256xf32, #tpu.memory_space<vmem>>, vector<1x256xf32>
    %5 = vector.broadcast %4 : vector<1x256xf32> to vector<16x256xf32>
    %6 = arith.addf %3, %5 : vector<16x256xf32>
    %7 = arith.truncf %6 : vector<16x256xf32> to vector<16x256xbf16>
    %c0_5 = arith.constant 0 : index
    %c0_6 = arith.constant 0 : index
    %8 = vector.load %arg4[%c0_5, %c0_6] : memref<16x256xbf16, #tpu.memory_space<vmem>>, vector<16x256xbf16>
    tpu.vector_store %arg4[%c0_5, %c0_6], %7 {strides = array<i32>} : memref<16x256xbf16, #tpu.memory_space<vmem>>, vector<16x256xbf16>,
    return
  }
  func.func @transform_0(%arg0: i32) -> (i32, i32) {
    %c0_i32 = arith.constant 0 : i32
    %c0_i32_0 = arith.constant 0 : i32
    return %arg0, %c0_i32 : i32, i32
  }
  func.func @transform_1(%arg0: i32) -> (i32, i32) {
    %c0_i32 = arith.constant 0 : i32
    %c0_i32_0 = arith.constant 0 : i32
    %c0_i32_1 = arith.constant 0 : i32
    return %c0_i32, %c0_i32_0 : i32, i32
  }
  func.func @transform_2(%arg0: i32) -> (i32, i32) {
    %c0_i32 = arith.constant 0 : i32
    %c0_i32_0 = arith.constant 0 : i32
    %c0_i32_1 = arith.constant 0 : i32
    return %c0_i32, %c0_i32_0 : i32, i32
  }
  func.func @transform_3(%arg0: i32) -> (i32, i32) {
    %c0_i32 = arith.constant 0 : i32
    %c0_i32_0 = arith.constant 0 : i32
    return %arg0, %c0_i32 : i32, i32
  }
}

</mosaic_0001>

<bundles_post_ra>
// kernel: tpu_custom_call.1
= control target key start
LH: loop header
LB: loop body
LE: loop exit
PB: predicated region body
PF: predicated region fallthrough
CT: control target
= control target key end

     0   :  { %8 = vsyncpa [#allocation3], 0  ;;  %s563_s0 = inlined_call_operand.hbm [shape: f32[16,256], index: 0, kind: input, shape index: {}]   ;;  %s564_s1 = inlined_call_operand.hbm [shape: bf16[256,256], index: 1, kind: input, shape index: {}]   ;;  %s565_s2 = inlined_call_operand.vmem [shape: f32[1,256], index: 2, kind: input, shape index: {}]   ;;  %s566_s3 = inlined_call_operand.hbm [shape: bf16[16,256], index: 3, kind: output, shape index: {}]  }
   0x1   :  { %9 = vsyncpa [#allocation6], 0 }
   0x2   :  { %10 = vsyncpa [#allocation4], 0  ;;  %s491_s12 = smov [#allocation2]   ;;  %s419_s16 = scalar_lea.hbm %s563_s0, 512 }
   0x3   :  { %s16_s13 = sshll.u32 %s491_s12, 4  ;;  %p420_p0 = scmp.ne.s32.totalorder %s563_s0, %s419_s16  ;;  %s17_s13 = int_to_ptr.vmem [resolvable:$true] %s16_s13 }
   0x4   :  { %p423_p1 = scmp.lt.u32.totalorder %s419_s16, %s563_s0 }
   0x6   :  { %p425_p2 = pnand %p423_p1, %p420_p0 }
   0x8   :  { %428 = shalt.err (!%p425_p2)
}
   0x9   :  { %s429_s21 = scalar_lea.vmem %s17_s13, 512  ;;  %p434_p4 = scmp.lt.s32.totalorder %s17_s13, %s17_s13 }
   0xa   :  { %p430_p3 = scmp.ne.s32.totalorder %s17_s13, %s429_s21  ;;  %p435_p5 = scmp.lt.s32.totalorder %s429_s21, %s429_s21 }
   0xc   :  { %p436_p6 = por %p435_p5, %p434_p4 }
   0xe   :  { %p437_p7 = pnand %p436_p6, %p430_p3 }
  0x10   :  { %440 = shalt.err (!%p437_p7)
}
  0x11   :  { %s492_s22 = smov 256   ;;  %s493_s23 = smov 16  }
  0x12   :  { %22 = dma.hbm_to_vmem [thread:$0]  %s563_s0, 512, %s17_s13, [#allocation3], %s492_s22, %s492_s22, %s493_s23  }
  0x13   :  { %s494_s26 = smov [#allocation5]   ;;  %s441_s30 = scalar_lea.hbm %s564_s1, 4096 }
  0x14   :  { %s28_s27 = sshll.u32 %s494_s26, 4  ;;  %p442_p8 = scmp.ne.s32.totalorder %s564_s1, %s441_s30  ;;  %s29_s27 = int_to_ptr.vmem [resolvable:$true] %s28_s27 }
  0x15   :  { %p445_p9 = scmp.lt.u32.totalorder %s441_s30, %s564_s1 }
  0x17   :  { %p447_p10 = pnand %p445_p9, %p442_p8 }
  0x19   :  { %450 = shalt.err (!%p447_p10)
}
  0x1a   :  { %s451_s8 = scalar_lea.vmem %s29_s27, 4096  ;;  %p456_p12 = scmp.lt.s32.totalorder %s29_s27, %s29_s27 }
  0x1b   :  { %p452_p11 = scmp.ne.s32.totalorder %s29_s27, %s451_s8  ;;  %p457_p13 = scmp.lt.s32.totalorder %s451_s8, %s451_s8 }
  0x1d   :  { %p458_p0 = por %p457_p13, %p456_p12 }
  0x1f   :  { %p459_p1 = pnand %p458_p0, %p452_p11 }
  0x21   :  { %462 = shalt.err (!%p459_p1)
}
  0x22   :  { %s495_s0 = smov 128   ;;  %s496_s9 = smov 8  }
  0x23   :  { %34 = dma.hbm_to_vmem [thread:$0]  %s564_s1, 4096, %s29_s27, [#allocation6], %s495_s0, %s495_s0, %s496_s9  }
  0x24   :  { %485 = dma.done.wait [#allocation3], 512  }
  0x25   :  { %486 = vsyncadd [#allocation3], 4294966784 }
  0x26   :  { %487 = dma.done.wait [#allocation6], 4096  }
  0x27   :  { %488 = vsyncadd [#allocation6], 4294963200  ;;  %v371_v0 = vld [vmem:[#allocation5 + $0x4] ss:$8 sps:$4 sm:$0xff]   ;;  %v373_v1 = vld [vmem:[#allocation5] ss:$8 sps:$4 sm:$0xff]   ;;  %v83_v38 = vlaneseq }
  0x28   :  { %253 = vmatprep.subr.bf16.mxu0 %v371_v0  ;;  %v374_v2 = vld [vmem:[#allocation5 + $0x14] ss:$8 sps:$4 sm:$0xff]   ;;  %v376_v3 = vld [vmem:[#allocation5 + $0x10] ss:$8 sps:$4 sm:$0xff]   ;;  %v377_v4 = vld [vmem:[#allocation5 + $0x24] ss:$8 sps:$4 sm:$0xff]  }
  0x29   :  { %254 = vmatpush1.bf16.msra.mxu0 %v373_v1  ;;  %v379_v5 = vld [vmem:[#allocation5 + $0x20] ss:$8 sps:$4 sm:$0xff]   ;;  %v380_v6 = vld [vmem:[#allocation5 + $0x34] ss:$8 sps:$4 sm:$0xff]   ;;  %v382_v7 = vld [vmem:[#allocation5 + $0x30] ss:$8 sps:$4 sm:$0xff]  }
  0x2a   :  { %255 = vmatprep.subr.bf16.mxu0 %v374_v2  ;;  %v383_v8 = vld [vmem:[#allocation5 + $0x44] ss:$8 sps:$4 sm:$0xff]   ;;  %v385_v9 = vld [vmem:[#allocation5 + $0x40] ss:$8 sps:$4 sm:$0xff]   ;;  %v386_v10 = vld [vmem:[#allocation5 + $0x54] ss:$8 sps:$4 sm:$0xff]  }
  0x2b   :  { %v388_v11 = vld [vmem:[#allocation5 + $0x50] ss:$8 sps:$4 sm:$0xff]   ;;  %v389_v12 = vld [vmem:[#allocation5 + $0x64] ss:$8 sps:$4 sm:$0xff]   ;;  %v391_v16 = vld [vmem:[#allocation5 + $0x60] ss:$8 sps:$4 sm:$0xff]  }
  0x2c   :  { %v44_v13 = vld [vmem:[#allocation2 + $0x8] sm:$0xff]  ;;  %v46_v14 = vld [vmem:[#allocation2 + $0x18] sm:$0xff]  ;;  %v43_v35 = vld [vmem:[#allocation2] sm:$0xff]  ;;  %v84_v39 = vshrl.u32 %v83_v38, 7  ;;  %s497_s13 = smov [#allocation7]  }
  0x2d   :  { %256 = vmatpush1.bf16.msra.mxu0 %v376_v3  ;;  %v48_v15 = vpack.c.bf16 %v46_v14, %v44_v13  ;;  %v392_v17 = vld [vmem:[#allocation5 + $0x74] ss:$8 sps:$4 sm:$0xff]   ;;  %v394_v18 = vld [vmem:[#allocation5 + $0x70] ss:$8 sps:$4 sm:$0xff]   ;;  %v395_v19 = vld [vmem:[#allocation5 + $0x84] ss:$8 sps:$4 sm:$0xff]  }
  0x2e   :  { %257 = vmatprep.subr.bf16.mxu0 %v377_v4  ;;  %v397_v20 = vld [vmem:[#allocation5 + $0x80] ss:$8 sps:$4 sm:$0xff]   ;;  %v398_v21 = vld [vmem:[#allocation5 + $0x94] ss:$8 sps:$4 sm:$0xff]   ;;  %v400_v22 = vld [vmem:[#allocation5 + $0x90] ss:$8 sps:$4 sm:$0xff]  }
  0x2f   :  { %285 = vmatprep.mubr.bf16.mxu0 %v48_v15  ;;  %v401_v23 = vld [vmem:[#allocation5 + $0xa4] ss:$8 sps:$4 sm:$0xff]   ;;  %v403_v24 = vld [vmem:[#allocation5 + $0xa0] ss:$8 sps:$4 sm:$0xff]   ;;  %v404_v25 = vld [vmem:[#allocation5 + $0xb4] ss:$8 sps:$4 sm:$0xff]  }
  0x30   :  { %v406_v26 = vld [vmem:[#allocation5 + $0xb0] ss:$8 sps:$4 sm:$0xff]   ;;  %v407_v27 = vld [vmem:[#allocation5 + $0xc4] ss:$8 sps:$4 sm:$0xff]   ;;  %v409_v28 = vld [vmem:[#allocation5 + $0xc0] ss:$8 sps:$4 sm:$0xff]  }
  0x31   :  { %258 = vmatpush1.bf16.msra.mxu0 %v379_v5  ;;  %v410_v29 = vld [vmem:[#allocation5 + $0xd4] ss:$8 sps:$4 sm:$0xff]   ;;  %v412_v30 = vld [vmem:[#allocation5 + $0xd0] ss:$8 sps:$4 sm:$0xff]   ;;  %v413_v31 = vld [vmem:[#allocation5 + $0xe4] ss:$8 sps:$4 sm:$0xff]  }
  0x32   :  { %259 = vmatprep.subr.bf16.mxu0 %v380_v6  ;;  %v415_v32 = vld [vmem:[#allocation5 + $0xe0] ss:$8 sps:$4 sm:$0xff]   ;;  %v416_v33 = vld [vmem:[#allocation5 + $0xf4] ss:$8 sps:$4 sm:$0xff]   ;;  %v418_v34 = vld [vmem:[#allocation5 + $0xf0] ss:$8 sps:$4 sm:$0xff]  }
  0x33   :  { %v45_v36 = vld [vmem:[#allocation2 + $0x10] sm:$0xff]  ;;  %v85_v40 = vsub.s32 0, %v84_v39  ;;  %v81_v41 = vld [vmem:[%s565_s2] sm:$0x3]  ;;  %v89_v42 = vsub.s32 1, %v84_v39  ;;  %s315_s14 = sshll.u32 %s497_s13, 4  ;;  %s316_s14 = int_to_ptr.vmem [resolvable:$true] %s315_s14 }
  0x34   :  { %v47_v37 = vpack.c.bf16 %v45_v36, %v43_v35  ;;  %s463_s15 = scalar_lea.vmem %s316_s14, 256  ;;  %p468_p3 = scmp.lt.s32.totalorder %s316_s14, %s316_s14 }
  0x35   :  { %260 = vmatpush1.bf16.msra.mxu0 %v382_v7  ;;  %v86_v43 = vrot.slane %v81_v41, %v85_v40  ;;  %v90_v44 = vrot.slane %v81_v41, %v89_v42  ;;  %p464_p2 = scmp.ne.s32.totalorder %s316_s14, %s463_s15  ;;  %p469_p4 = scmp.lt.s32.totalorder %s463_s15, %s463_s15 }
  0x36   :  { %261 = vmatprep.subr.bf16.mxu0 %v383_v8 }
  0x37   :  { %p470_p5 = por %p469_p4, %p468_p3 }
  0x39   :  { %262 = vmatpush1.bf16.msra.mxu0 %v385_v9  ;;  %p471_p6 = pnand %p470_p5, %p464_p2 }
  0x3a   :  { %263 = vmatprep.subr.bf16.mxu0 %v386_v10 }
  0x3d   :  { %264 = vmatpush1.bf16.msra.mxu0 %v388_v11 }
  0x3e   :  { %265 = vmatprep.subr.bf16.mxu0 %v389_v12 }
  0x41   :  { %266 = vmatpush1.bf16.msra.mxu0 %v391_v16 }
  0x42   :  { %267 = vmatprep.subr.bf16.mxu0 %v392_v17 }
  0x45   :  { %268 = vmatpush1.bf16.msra.mxu0 %v394_v18 }
  0x46   :  { %269 = vmatprep.subr.bf16.mxu0 %v395_v19 }
  0x49   :  { %270 = vmatpush1.bf16.msra.mxu0 %v397_v20 }
  0x4a   :  { %271 = vmatprep.subr.bf16.mxu0 %v398_v21 }
  0x4d   :  { %272 = vmatpush1.bf16.msra.mxu0 %v400_v22 }
  0x4e   :  { %273 = vmatprep.subr.bf16.mxu0 %v401_v23 }
  0x51   :  { %274 = vmatpush1.bf16.msra.mxu0 %v403_v24 }
  0x52   :  { %275 = vmatprep.subr.bf16.mxu0 %v404_v25 }
  0x55   :  { %276 = vmatpush1.bf16.msra.mxu0 %v406_v26 }
  0x56   :  { %277 = vmatprep.subr.bf16.mxu0 %v407_v27 }
  0x59   :  { %278 = vmatpush1.bf16.msra.mxu0 %v409_v28 }
  0x5a   :  { %279 = vmatprep.subr.bf16.mxu0 %v410_v29 }
  0x5d   :  { %280 = vmatpush1.bf16.msra.mxu0 %v412_v30 }
  0x5e   :  { %281 = vmatprep.subr.bf16.mxu0 %v413_v31 }
  0x61   :  { %282 = vmatpush1.bf16.msra.mxu0 %v415_v32 }
  0x62   :  { %283 = vmatprep.subr.bf16.mxu0 %v416_v33 }
  0x65   :  { %284 = vmatpush1.bf16.msra.mxu0 %v418_v34 }
  0x68   :  { %286 = vmatmul.mubr.bf16.vlgmr.msra.gmra.mrb[0].mxu0 %v47_v37 }
 0x13b   :  { %v287_v45 = vpop.f32.mrb[0].mxu0 }
 0x13c   :  { %v288_v46 = vadd.f32 %v287_v45, %v86_v43  ;;  %v289_v47 = vpop.f32.mrb[1].mxu0 }
 0x13d   :  { %v290_v48 = vadd.f32 %v289_v47, %v90_v44  ;;  %v291_v49 = vpop.f32.mrb[2].mxu0 }
 0x13e   :  { %v292_v50 = vadd.f32 %v291_v49, %v86_v43  ;;  %v293_v51 = vpop.f32.mrb[3].mxu0 }
 0x13f   :  { %v362_v52 = vpack.c.bf16 %v290_v48, %v288_v46  ;;  %v294_v53 = vadd.f32 %v293_v51, %v90_v44 }
 0x141   :  { %308 = vst [vmem:[#allocation7] sm:$0xff] %v362_v52  ;;  %v363_v54 = vpack.c.bf16 %v294_v53, %v292_v50 }
 0x143   :  { %309 = vst [vmem:[#allocation7 + $0x8] sm:$0xff] %v363_v54 }
 0x144   :  { %474 = shalt.err (!%p471_p6)
}
 0x145   :  { %s475_s17 = scalar_lea.hbm %s566_s3, 256 }
 0x146   :  { %p476_p7 = scmp.ne.s32.totalorder %s566_s3, %s475_s17  ;;  %p479_p8 = scmp.lt.u32.totalorder %s475_s17, %s566_s3 }
 0x148   :  { %p481_p9 = pnand %p479_p8, %p476_p7 }
 0x14a   :  { %484 = shalt.err (!%p481_p9)
}
 0x14b   :  { %321 = dma.vmem_to_hbm [thread:$0]  %s316_s14, 256, %s566_s3, [#allocation4], %s495_s0, %s495_s0, %s496_s9  }
 0x14c   :  { %489 = dma.done.wait [#allocation4], 256  }
 0x14d   :  { %490 = vsyncadd [#allocation4], 4294967040 }
 0x14e   :  { %325 = vsyncpa [#allocation3], 1 }
 0x14f   :  { %326 = vsyncpa [#allocation6], 1 }
 0x150   :  { %327 = vsyncpa [#allocation4], 1 }

</bundles_post_ra>
